<compile_context>
chip_gen: v7x
topology: tpu7x:2x2x1
jax: 0.10.0
libtpu: 0.0.40
codegen_flags: <defaults>
</compile_context>

<pallas_src>
import functools

import jax
import jax.numpy as jnp
from jax import lax
from jax.experimental import pallas as pl
from jax.experimental.pallas import tpu as pltpu

# lhs (out, in) contracted with rhs (batch, in) on the "in" dims -> (out, batch).
_NT_DIMS = (((1,), (1,)), ((), ()))

# Batches at/below this run as one resident grid step (overhead >> traffic);
# above it we always emit >= 2 lane-aligned tiles so both v7x TensorCores work.
_SINGLE_STEP_MAX_ROWS = 4096


def _mlp_kernel(x_ref, w1_ref, b1_ref, w2_ref, b2_ref, w3_ref, b3_ref, o_ref):
    # Cast the streamed x tile to bf16 in-kernel (VPU, hidden under DMA slack).
    x_bf = x_ref[...].astype(jnp.bfloat16)
    # Layer 1: (H1, D) x (bn, D)^T -> (H1, bn); bf16 operands, f32 accumulate.
    h1 = lax.dot_general(w1_ref[...], x_bf, _NT_DIMS,
                         preferred_element_type=jnp.float32)
    h1 = jnp.maximum(h1 + b1_ref[...], 0.0)          # bias+ReLU in f32 (Dropout p=0 elided)
    # Layer 2: (H2, H1) x (H1, bn) -> (H2, bn)
    h2 = jnp.dot(w2_ref[...], h1.astype(jnp.bfloat16),
                 preferred_element_type=jnp.float32)
    h2 = jnp.maximum(h2 + b2_ref[...], 0.0)
    # Layer 3: (O, H2) x (H2, bn) -> (O, bn)  -- lane-dense output row(s).
    out = jnp.dot(w3_ref[...], h2.astype(jnp.bfloat16),
                  preferred_element_type=jnp.float32)
    out = out + b3_ref[...]
    out = jnp.clip(out, -1e10, 1e10)                 # torch.clamp(-1e10, 1e10)
    o_ref[...] = jax.nn.sigmoid(out)                 # torch.sigmoid


def _round_up(n, m):
    return -(-n // m) * m


def _choose_block(n_rows, block_n):
    """Row-tile size: lane-aligned (128) unless it equals the full batch."""
    if n_rows <= _SINGLE_STEP_MAX_ROWS:
        return n_rows                                  # one resident step
    if n_rows <= block_n:
        # Split into >= 2 tiles so the parallel axis shards across v7x's 2 TCs.
        return min(_round_up((n_rows + 1) // 2, 128), block_n)
    return block_n


def _vmem_limit_bytes(bn, d, h1, h2, o, x_itemsize):
    """Conservative VMEM budget for the chosen tile, clamped to v7x's 64 MiB."""
    lane = lambda n: _round_up(n, 128)
    sub = lambda n: _round_up(n, 8)
    est = 2 * bn * lane(d) * x_itemsize                      # double-buffered x tiles
    est += bn * (sub(h1) + sub(h2)) * (4 + 2)                # f32 h1/h2 + bf16 copies
    est += 2 * sub(o) * bn * 4                               # double-buffered output tile
    est += 2 * (h1 * lane(d) + h2 * lane(h1) + sub(o) * lane(h2)) * 2   # bf16 weights
    est += 2 * (sub(h1) + sub(h2) + sub(o)) * 128 * 4                   # f32 biases
    return int(min(max(2 * est, 32 << 20), 56 << 20))


@functools.partial(jax.jit, static_argnames=("block_n",))
def link_classifier_mlp(x, w1, b1, w2, b2, w3, b3, *, block_n=8192):
    """x: (N, dim) in f32 or bf16 (bf16 halves the dominant HBM stream).
    Weights in PyTorch nn.Linear layout w_k: (out, in); biases as (out, 1)."""
    N, D = x.shape
    H1 = w1.shape[0]
    H2 = w2.shape[0]
    O = w3.shape[0]

    # Weights are ~KiB: bf16 MXU operands, f32 biases. x is passed through as-is.
    w1_bf = w1.astype(jnp.bfloat16)
    w2_bf = w2.astype(jnp.bfloat16)
    w3_bf = w3.astype(jnp.bfloat16)
    b1f = b1.astype(jnp.float32)
    b2f = b2.astype(jnp.float32)
    b3f = b3.astype(jnp.float32)

    bn = _choose_block(N, block_n)
    grid = (pl.cdiv(N, bn),)
    vmem_limit = _vmem_limit_bytes(bn, D, H1, H2, O, x.dtype.itemsize)

    out_t = pl.pallas_call(
        _mlp_kernel,
        out_shape=jax.ShapeDtypeStruct((O, N), jnp.float32),
        grid_spec=pltpu.PrefetchScalarGridSpec(
            num_scalar_prefetch=0,
            grid=grid,
            in_specs=[
                pl.BlockSpec((bn, D), lambda i: (i, 0)),    # x rows (streamed tile)
                pl.BlockSpec((H1, D), lambda i: (0, 0)),    # W1 (VMEM-resident)
                pl.BlockSpec((H1, 1), lambda i: (0, 0)),    # b1
                pl.BlockSpec((H2, H1), lambda i: (0, 0)),   # W2
                pl.BlockSpec((H2, 1), lambda i: (0, 0)),    # b2
                pl.BlockSpec((O, H2), lambda i: (0, 0)),    # W3
                pl.BlockSpec((O, 1), lambda i: (0, 0)),     # b3
            ],
            out_specs=pl.BlockSpec((O, bn), lambda i: (0, i)),  # lane-dense (O, bn) tiles
        ),
        compiler_params=pltpu.CompilerParams(
            dimension_semantics=("parallel",),   # megacore-shards row tiles on v7x
            vmem_limit_bytes=vmem_limit,
        ),
    )(x, w1_bf, b1f, w2_bf, b2f, w3_bf, b3f)

    # (O, N) -> (N, O). For O == 1 a reshape is a pure relabeling (no copy).
    return out_t.reshape(N, O) if O == 1 else out_t.T


def init_params(key, dim):
    """PyTorch nn.Linear-style init: U(-1/sqrt(fan_in), 1/sqrt(fan_in)).
    Weights kept in PyTorch's (out_features, in_features) layout; biases as (out, 1)."""
    hidden1, hidden2, output = dim // 2, dim // 4, 1
    keys = jax.random.split(key, 6)

    def linear(kw, kb, fan_in, fan_out):
        bound = 1.0 / (fan_in ** 0.5)
        w = jax.random.uniform(kw, (fan_out, fan_in), jnp.float32, -bound, bound)
        b = jax.random.uniform(kb, (fan_out, 1), jnp.float32, -bound, bound)
        return w, b

    w1, b1 = linear(keys[0], keys[1], dim, hidden1)
    w2, b2 = linear(keys[2], keys[3], hidden1, hidden2)
    w3, b3 = linear(keys[4], keys[5], hidden2, output)
    return w1, b1, w2, b2, w3, b3


def _reference(x, w1, b1, w2, b2, w3, b3):
    """Pure-JAX reference with the same dtype policy as the kernel."""
    xb = x.astype(jnp.bfloat16)
    h1 = jnp.dot(xb, w1.astype(jnp.bfloat16).T, preferred_element_type=jnp.float32) + b1.T
    h1 = jnp.maximum(h1, 0.0).astype(jnp.bfloat16)
    h2 = jnp.dot(h1, w2.astype(jnp.bfloat16).T, preferred_element_type=jnp.float32) + b2.T
    h2 = jnp.maximum(h2, 0.0).astype(jnp.bfloat16)
    o = jnp.dot(h2, w3.astype(jnp.bfloat16).T, preferred_element_type=jnp.float32) + b3.T
    return jax.nn.sigmoid(jnp.clip(o, -1e10, 1e10))


if __name__ == "__main__":
    dim = 64            # -> hidden1=32, hidden2=16, output=1

    key = jax.random.PRNGKey(0)
    k_x, k_p = jax.random.split(key)
    params = init_params(k_p, dim)

    # 1) Small batch: single resident grid step (no pipeline overhead).
    x1 = jax.random.normal(k_x, (1024, dim), jnp.float32)
    out1 = jax.block_until_ready(link_classifier_mlp(x1, *params))
    assert out1.shape == (1024, 1)
    ref1 = _reference(x1, *params)
    assert jnp.allclose(out1, ref1, atol=1e-3, rtol=1e-3)

    # 2) Mid-size batch above the split threshold: >= 2 lane-aligned tiles
    #    (megacore path) with a ragged tail handled by the cdiv grid.
    x2 = jax.random.normal(k_x, (5000, dim), jnp.float32)
    out2 = jax.block_until_ready(link_classifier_mlp(x2, *params))
    assert out2.shape == (5000, 1)
    ref2 = _reference(x2, *params)
    assert jnp.allclose(out2, ref2, atol=1e-3, rtol=1e-3)

    # 3) Tiny batch sanity check.
    out3 = jax.block_until_ready(link_classifier_mlp(x1[:16], *params))
    assert out3.shape == (16, 1)
    assert jnp.allclose(out3, ref1[:16], atol=1e-3, rtol=1e-3)

    print("KERNEL_OK")
</pallas_src>

<mosaic_0001>
module attributes {stable_mosaic.version = 11 : i64} {
  func.func @_mlp_kernel(%arg0: i32, %arg1: memref<1024x64xf32, #tpu.memory_space<vmem>>, %arg2: memref<32x64xbf16, #tpu.memory_space<vmem>>, %arg3: memref<32x1xf32, #tpu.memory_space<vmem>>, %arg4: memref<16x32xbf16, #tpu.memory_space<vmem>>, %arg5: memref<16x1xf32, #tpu.memory_space<vmem>>, %arg6: memref<1x16xbf16, #tpu.memory_space<vmem>>, %arg7: memref<1x1xf32, #tpu.memory_space<vmem>>, %arg8: memref<1x1024xf32, #tpu.memory_space<vmem>>) attributes {dimension_semantics = [#tpu.dimension_semantics<parallel>], iteration_bounds = array<i64: 1>, scalar_prefetch = 0 : i64, scratch_operands = 0 : i64, tpu.core_type = #tpu.core_type<tc>, window_params = [{transform_indices = @transform_0, window_bounds = array<i64: 1024, 64>}, {pipeline_mode = #tpu.pipeline_mode<synchronous>, transform_indices = @transform_1, window_bounds = array<i64: 32, 64>}, {pipeline_mode = #tpu.pipeline_mode<synchronous>, transform_indices = @transform_2, window_bounds = array<i64: 32, 1>}, {pipeline_mode = #tpu.pipeline_mode<synchronous>, transform_indices = @transform_3, window_bounds = array<i64: 16, 32>}, {pipeline_mode = #tpu.pipeline_mode<synchronous>, transform_indices = @transform_4, window_bounds = array<i64: 16, 1>}, {pipeline_mode = #tpu.pipeline_mode<synchronous>, transform_indices = @transform_5, window_bounds = array<i64: 1, 16>}, {pipeline_mode = #tpu.pipeline_mode<synchronous>, transform_indices = @transform_6, window_bounds = array<i64: 1, 1>}, {transform_indices = @transform_7, window_bounds = array<i64: 1, 1024>}]} {
    %c0 = arith.constant 0 : index
    %c0_0 = arith.constant 0 : index
    %0 = vector.load %arg1[%c0, %c0_0] : memref<1024x64xf32, #tpu.memory_space<vmem>>, vector<1024x64xf32>
    %1 = arith.truncf %0 : vector<1024x64xf32> to vector<1024x64xbf16>
    %c0_1 = arith.constant 0 : index
    %c0_2 = arith.constant 0 : index
    %2 = vector.load %arg2[%c0_1, %c0_2] : memref<32x64xbf16, #tpu.memory_space<vmem>>, vector<32x64xbf16>
    %cst = arith.constant dense<0.000000e+00> : vector<32x1024xf32>
    %3 = tpu.matmul %2, %1, %cst {dimension_numbers = #tpu.dot_dimension_numbers<[1], [1], [0], [0], [0, 0, 1, 0], [], []>} : vector<32x64xbf16>, vector<1024x64xbf16>, vector<32x1024xf32> -> vector<32x1024xf32>
    %c0_3 = arith.constant 0 : index
    %c0_4 = arith.constant 0 : index
    %4 = vector.load %arg3[%c0_3, %c0_4] : memref<32x1xf32, #tpu.memory_space<vmem>>, vector<32x1xf32>
    %5 = vector.broadcast %4 : vector<32x1xf32> to vector<32x1024xf32>
    %6 = arith.addf %3, %5 : vector<32x1024xf32>
    %cst_5 = arith.constant 0.000000e+00 : f32
    %7 = vector.broadcast %cst_5 : f32 to vector<32x1024xf32>
    %8 = arith.maximumf %6, %7 : vector<32x1024xf32>
    %c0_6 = arith.constant 0 : index
    %c0_7 = arith.constant 0 : index
    %9 = vector.load %arg4[%c0_6, %c0_7] : memref<16x32xbf16, #tpu.memory_space<vmem>>, vector<16x32xbf16>
    %10 = arith.truncf %8 : vector<32x1024xf32> to vector<32x1024xbf16>
    %cst_8 = arith.constant dense<0.000000e+00> : vector<16x1024xf32>
    %11 = tpu.matmul %9, %10, %cst_8 {dimension_numbers = #tpu.dot_dimension_numbers<[1], [0], [0], [1], [0, 0, 1, 1], [], []>} : vector<16x32xbf16>, vector<32x1024xbf16>, vector<16x1024xf32> -> vector<16x1024xf32>
    %c0_9 = arith.constant 0 : index
    %c0_10 = arith.constant 0 : index
    %12 = vector.load %arg5[%c0_9, %c0_10] : memref<16x1xf32, #tpu.memory_space<vmem>>, vector<16x1xf32>
    %13 = vector.broadcast %12 : vector<16x1xf32> to vector<16x1024xf32>
    %14 = arith.addf %11, %13 : vector<16x1024xf32>
    %cst_11 = arith.constant 0.000000e+00 : f32
    %15 = vector.broadcast %cst_11 : f32 to vector<16x1024xf32>
    %16 = arith.maximumf %14, %15 : vector<16x1024xf32>
    %c0_12 = arith.constant 0 : index
    %c0_13 = arith.constant 0 : index
    %17 = vector.load %arg6[%c0_12, %c0_13] : memref<1x16xbf16, #tpu.memory_space<vmem>>, vector<1x16xbf16>
    %18 = arith.truncf %16 : vector<16x1024xf32> to vector<16x1024xbf16>
    %cst_14 = arith.constant dense<0.000000e+00> : vector<1x1024xf32>
    %19 = tpu.matmul %17, %18, %cst_14 {dimension_numbers = #tpu.dot_dimension_numbers<[1], [0], [0], [1], [0, 0, 1, 1], [], []>} : vector<1x16xbf16>, vector<16x1024xbf16>, vector<1x1024xf32> -> vector<1x1024xf32>
    %c0_15 = arith.constant 0 : index
    %c0_16 = arith.constant 0 : index
    %20 = vector.load %arg7[%c0_15, %c0_16] : memref<1x1xf32, #tpu.memory_space<vmem>>, vector<1x1xf32>
    %21 = vector.broadcast %20 : vector<1x1xf32> to vector<1x1024xf32>
    %22 = arith.addf %19, %21 : vector<1x1024xf32>
    %cst_17 = arith.constant -1.000000e+10 : f32
    %cst_18 = arith.constant 1.000000e+10 : f32
    %23 = vector.broadcast %cst_17 : f32 to vector<1x1024xf32>
    %24 = arith.maximumf %23, %22 : vector<1x1024xf32>
    %25 = vector.broadcast %cst_18 : f32 to vector<1x1024xf32>
    %26 = arith.minimumf %25, %24 : vector<1x1024xf32>
    %27 = arith.negf %26 : vector<1x1024xf32>
    %28 = math.exp %27 : vector<1x1024xf32>
    %cst_19 = arith.constant 1.000000e+00 : f32
    %29 = vector.broadcast %cst_19 : f32 to vector<1x1024xf32>
    %30 = arith.addf %29, %28 : vector<1x1024xf32>
    %31 = arith.divf %29, %30 : vector<1x1024xf32>
    %c0_20 = arith.constant 0 : index
    %c0_21 = arith.constant 0 : index
    %32 = vector.load %arg8[%c0_20, %c0_21] : memref<1x1024xf32, #tpu.memory_space<vmem>>, vector<1x1024xf32>
    tpu.vector_store %arg8[%c0_20, %c0_21], %31 {strides = array<i32>} : memref<1x1024xf32, #tpu.memory_space<vmem>>, vector<1x1024xf32>,
    return
  }
  func.func @transform_0(%arg0: i32) -> (i32, i32) {
    %c0_i32 = arith.constant 0 : i32
    %c0_i32_0 = arith.constant 0 : i32
    return %arg0, %c0_i32 : i32, i32
  }
  func.func @transform_1(%arg0: i32) -> (i32, i32) {
    %c0_i32 = arith.constant 0 : i32
    %c0_i32_0 = arith.constant 0 : i32
    %c0_i32_1 = arith.constant 0 : i32
    return %c0_i32, %c0_i32_0 : i32, i32
  }
  func.func @transform_2(%arg0: i32) -> (i32, i32) {
    %c0_i32 = arith.constant 0 : i32
    %c0_i32_0 = arith.constant 0 : i32
    %c0_i32_1 = arith.constant 0 : i32
    return %c0_i32, %c0_i32_0 : i32, i32
  }
  func.func @transform_3(%arg0: i32) -> (i32, i32) {
    %c0_i32 = arith.constant 0 : i32
    %c0_i32_0 = arith.constant 0 : i32
    %c0_i32_1 = arith.constant 0 : i32
    return %c0_i32, %c0_i32_0 : i32, i32
  }
  func.func @transform_4(%arg0: i32) -> (i32, i32) {
    %c0_i32 = arith.constant 0 : i32
    %c0_i32_0 = arith.constant 0 : i32
    %c0_i32_1 = arith.constant 0 : i32
    return %c0_i32, %c0_i32_0 : i32, i32
  }
  func.func @transform_5(%arg0: i32) -> (i32, i32) {
    %c0_i32 = arith.constant 0 : i32
    %c0_i32_0 = arith.constant 0 : i32
    %c0_i32_1 = arith.constant 0 : i32
    return %c0_i32, %c0_i32_0 : i32, i32
  }
  func.func @transform_6(%arg0: i32) -> (i32, i32) {
    %c0_i32 = arith.constant 0 : i32
    %c0_i32_0 = arith.constant 0 : i32
    %c0_i32_1 = arith.constant 0 : i32
    return %c0_i32, %c0_i32_0 : i32, i32
  }
  func.func @transform_7(%arg0: i32) -> (i32, i32) {
    %c0_i32 = arith.constant 0 : i32
    %c0_i32_0 = arith.constant 0 : i32
    return %c0_i32, %arg0 : i32, i32
  }
}

</mosaic_0001>

<bundles_post_ra>
// kernel: link_classifier_mlp.1
= control target key start
LH: loop header
LB: loop body
LE: loop exit
PB: predicated region body
PF: predicated region fallthrough
CT: control target
= control target key end

     0   :  { %s2101_s0 = inlined_call_operand.vmem [shape: f32[1024,64], index: 0, kind: input, shape index: {}]   ;;  %s2102_s1 = inlined_call_operand.vmem [shape: bf16[32,64], index: 1, kind: input, shape index: {}]   ;;  %s2103_s2 = inlined_call_operand.vmem [shape: f32[32,1], index: 2, kind: input, shape index: {}]   ;;  %s2104_s3 = inlined_call_operand.vmem [shape: bf16[16,32], index: 3, kind: input, shape index: {}]   ;;  %s2105_s4 = inlined_call_operand.vmem [shape: f32[16,1], index: 4, kind: input, shape index: {}]   ;;  %s2106_s5 = inlined_call_operand.vmem [shape: bf16[1,16], index: 5, kind: input, shape index: {}]   ;;  %s2107_s6 = inlined_call_operand.<no memory space> [shape: f32[1,1], index: 6, kind: input, shape index: {}]   ;;  %s2108_s7 = inlined_call_operand.hbm [shape: f32[1,1024], index: 7, kind: output, shape index: {}]  }
   0x1   :  { %v12_v0 = vstv %s2107_s6 }
   0x2   :  { %13 = vst [vmem:[#allocation2] sm:$0x1] %v12_v0 }
   0x3   :  { %v46_v1 = vld [vmem:[%s2101_s0 + $0x80] sm:$0xff]  ;;  %v47_v2 = vld [vmem:[%s2101_s0 + $0x88] sm:$0xff]  ;;  %vm260_vm0 = vcmask 523264   ;;  %v48_v12 = vld [vmem:[%s2101_s0 + $0x90] sm:$0xff]  ;;  %v1465_v43 = vmov 0  }
   0x4   :  { %v78_v3 = vld [vmem:[%s2101_s0 + $0x180] sm:$0xff]  ;;  %v166_v4 = vpack.c.bf16 %v47_v2, %v46_v1  ;;  %v79_v5 = vld [vmem:[%s2101_s0 + $0x188] sm:$0xff]  ;;  %v49_v14 = vld [vmem:[%s2101_s0 + $0x98] sm:$0xff]  ;;  %1404 = vset.pattern.permute.xlu0 %v1465_v43  ;;  %1405 = vset.pattern.permute.xlu1 %v1465_v43 }
   0x5   :  { %v30_v6 = vld [vmem:[%s2101_s0] sm:$0xff]  ;;  %v31_v7 = vld [vmem:[%s2101_s0 + $0x8] sm:$0xff]  ;;  %v182_v8 = vpack.c.bf16 %v79_v5, %v78_v3  ;;  %v80_v15 = vld [vmem:[%s2101_s0 + $0x190] sm:$0xff]  ;;  %v167_v18 = vpack.c.bf16 %v49_v14, %v48_v12 }
   0x6   :  { %v158_v9 = vpack.c.bf16 %v31_v7, %v30_v6  ;;  %v62_v10 = vld [vmem:[%s2101_s0 + $0x100] sm:$0xff]  ;;  %v63_v11 = vld [vmem:[%s2101_s0 + $0x108] sm:$0xff]  ;;  %1369 = vmatprep.subr.msk.bf16.mxu0 %vm260_vm0, %v166_v4  ;;  %v81_v16 = vld [vmem:[%s2101_s0 + $0x198] sm:$0xff] }
   0x7   :  { %v174_v13 = vpack.c.bf16 %v63_v11, %v62_v10  ;;  %1377 = vmatprep.subr.msk.bf16.mxu1 %vm260_vm0, %v182_v8  ;;  %v183_v19 = vpack.c.bf16 %v81_v16, %v80_v15  ;;  %v32_v20 = vld [vmem:[%s2101_s0 + $0x10] sm:$0xff]  ;;  %v33_v21 = vld [vmem:[%s2101_s0 + $0x18] sm:$0xff]  ;;  %v50_v27 = vld [vmem:[%s2101_s0 + $0xa0] sm:$0xff] }
   0x8   :  { %v268_v17 = vsel %vm260_vm0, %v158_v9, 0  ;;  %v64_v22 = vld [vmem:[%s2101_s0 + $0x110] sm:$0xff]  ;;  %v65_v24 = vld [vmem:[%s2101_s0 + $0x118] sm:$0xff]  ;;  %v159_v25 = vpack.c.bf16 %v33_v21, %v32_v20  ;;  %v51_v28 = vld [vmem:[%s2101_s0 + $0xa8] sm:$0xff] }
   0x9   :  { %1290 = vmatpush3.bf16.xpose.msra.mxu0 %v268_v17  ;;  %v316_v23 = vsel %vm260_vm0, %v174_v13, 0  ;;  %v175_v26 = vpack.c.bf16 %v65_v24, %v64_v22  ;;  %v82_v29 = vld [vmem:[%s2101_s0 + $0x1a0] sm:$0xff]  ;;  %v83_v30 = vld [vmem:[%s2101_s0 + $0x1a8] sm:$0xff]  ;;  %v168_v32 = vpack.c.bf16 %v51_v28, %v50_v27  ;;  %v52_v41 = vld [vmem:[%s2101_s0 + $0xb0] sm:$0xff] }
   0xa   :  { %1310 = vmatpush3.bf16.xpose.msra.mxu1 %v316_v23  ;;  %1370 = vmatprep.subr.msk.bf16.mxu0 %vm260_vm0, %v167_v18  ;;  %v271_v31 = vsel %vm260_vm0, %v159_v25, 0  ;;  %v184_v34 = vpack.c.bf16 %v83_v30, %v82_v29  ;;  %v34_v35 = vld [vmem:[%s2101_s0 + $0x20] sm:$0xff]  ;;  %v35_v36 = vld [vmem:[%s2101_s0 + $0x28] sm:$0xff]  ;;  %v53_v42 = vld [vmem:[%s2101_s0 + $0xb8] sm:$0xff] }
   0xb   :  { %1378 = vmatprep.subr.msk.bf16.mxu1 %vm260_vm0, %v183_v19  ;;  %v319_v33 = vsel %vm260_vm0, %v175_v26, 0  ;;  %v66_v37 = vld [vmem:[%s2101_s0 + $0x120] sm:$0xff]  ;;  %v67_v38 = vld [vmem:[%s2101_s0 + $0x128] sm:$0xff]  ;;  %v160_v39 = vpack.c.bf16 %v35_v36, %v34_v35  ;;  %v84_v44 = vld [vmem:[%s2101_s0 + $0x1b0] sm:$0xff]  ;;  %v169_v47 = vpack.c.bf16 %v53_v42, %v52_v41 }
   0xc   :  { %v176_v40 = vpack.c.bf16 %v67_v38, %v66_v37  ;;  %v85_v45 = vld [vmem:[%s2101_s0 + $0x1b8] sm:$0xff]  ;;  %v36_v50 = vld [vmem:[%s2101_s0 + $0x30] sm:$0xff]  ;;  %v1625_v55 = vld [vmem:[%s2102_s1] sm:$0xff]  }
   0xd   :  { %v274_v46 = vsel %vm260_vm0, %v160_v39, 0  ;;  %v185_v49 = vpack.c.bf16 %v85_v45, %v84_v44  ;;  %v37_v51 = vld [vmem:[%s2101_s0 + $0x38] sm:$0xff]  ;;  %v68_v52 = vld [vmem:[%s2101_s0 + $0x130] sm:$0xff]  ;;  %v54_v57 = vld [vmem:[%s2101_s0 + $0xc0] sm:$0xff]  ;;  %1305 = vmatprep.mubr.msk.bf16.mxu0 %vm260_vm0, %v1625_v55  ;;  %1325 = vmatprep.mubr.msk.bf16.mxu1 %vm260_vm0, %v1625_v55 }
   0xe   :  { %v322_v48 = vsel %vm260_vm0, %v176_v40, 0  ;;  %v69_v53 = vld [vmem:[%s2101_s0 + $0x138] sm:$0xff]  ;;  %v161_v54 = vpack.c.bf16 %v37_v51, %v36_v50  ;;  %v55_v58 = vld [vmem:[%s2101_s0 + $0xc8] sm:$0xff]  ;;  %v86_v59 = vld [vmem:[%s2101_s0 + $0x1c0] sm:$0xff] }
   0xf   :  { %v177_v56 = vpack.c.bf16 %v69_v53, %v68_v52  ;;  %v87_v60 = vld [vmem:[%s2101_s0 + $0x1c8] sm:$0xff]  ;;  %v170_v62 = vpack.c.bf16 %v55_v58, %v54_v57  ;;  %v38_v1 = vld [vmem:[%s2101_s0 + $0x40] sm:$0xff]  ;;  %v56_v7 = vld [vmem:[%s2101_s0 + $0xd0] sm:$0xff] }
  0x10   :  { %v277_v61 = vsel %vm260_vm0, %v161_v54, 0  ;;  %v186_v0 = vpack.c.bf16 %v87_v60, %v86_v59  ;;  %v39_v2 = vld [vmem:[%s2101_s0 + $0x48] sm:$0xff]  ;;  %v70_v3 = vld [vmem:[%s2101_s0 + $0x140] sm:$0xff]  ;;  %v57_v8 = vld [vmem:[%s2101_s0 + $0xd8] sm:$0xff] }
  0x11   :  { %1292 = vmatpush3.bf16.xpose.msra.mxu0 %v271_v31  ;;  %v325_v63 = vsel %vm260_vm0, %v177_v56, 0  ;;  %v71_v4 = vld [vmem:[%s2101_s0 + $0x148] sm:$0xff]  ;;  %v162_v5 = vpack.c.bf16 %v39_v2, %v38_v1  ;;  %v88_v9 = vld [vmem:[%s2101_s0 + $0x1d0] sm:$0xff]  ;;  %v89_v10 = vld [vmem:[%s2101_s0 + $0x1d8] sm:$0xff]  ;;  %v171_v12 = vpack.c.bf16 %v57_v8, %v56_v7 }
  0x12   :  { %1312 = vmatpush3.bf16.xpose.msra.mxu1 %v319_v33  ;;  %1371 = vmatprep.subr.msk.bf16.mxu0 %vm260_vm0, %v168_v32  ;;  %v178_v6 = vpack.c.bf16 %v71_v4, %v70_v3  ;;  %v187_v14 = vpack.c.bf16 %v89_v10, %v88_v9  ;;  %v40_v15 = vld [vmem:[%s2101_s0 + $0x50] sm:$0xff]  ;;  %v41_v16 = vld [vmem:[%s2101_s0 + $0x58] sm:$0xff]  ;;  %v58_v21 = vld [vmem:[%s2101_s0 + $0xe0] sm:$0xff] }
  0x13   :  { %1379 = vmatprep.subr.msk.bf16.mxu1 %vm260_vm0, %v184_v34  ;;  %v280_v11 = vsel %vm260_vm0, %v162_v5, 0  ;;  %v72_v17 = vld [vmem:[%s2101_s0 + $0x150] sm:$0xff]  ;;  %v73_v18 = vld [vmem:[%s2101_s0 + $0x158] sm:$0xff]  ;;  %v163_v19 = vpack.c.bf16 %v41_v16, %v40_v15  ;;  %v59_v22 = vld [vmem:[%s2101_s0 + $0xe8] sm:$0xff] }
  0x14   :  { %v328_v13 = vsel %vm260_vm0, %v178_v6, 0  ;;  %v179_v20 = vpack.c.bf16 %v73_v18, %v72_v17  ;;  %v90_v23 = vld [vmem:[%s2101_s0 + $0x1e0] sm:$0xff]  ;;  %v91_v24 = vld [vmem:[%s2101_s0 + $0x1e8] sm:$0xff]  ;;  %v172_v26 = vpack.c.bf16 %v59_v22, %v58_v21  ;;  %v228_v34 = vld [vmem:[%s2103_s2 + $0x10] sm:$0xff] }
  0x15   :  { %v283_v25 = vsel %vm260_vm0, %v163_v19, 0  ;;  %v188_v28 = vpack.c.bf16 %v91_v24, %v90_v23  ;;  %v42_v29 = vld [vmem:[%s2101_s0 + $0x60] sm:$0xff]  ;;  %v43_v30 = vld [vmem:[%s2101_s0 + $0x68] sm:$0xff]  ;;  %v60_v36 = vld [vmem:[%s2101_s0 + $0xf0] sm:$0xff]  ;;  %242 = vperm.xlu1 %1405, %v228_v34  }
  0x16   :  { %v331_v27 = vsel %vm260_vm0, %v179_v20, 0  ;;  %v74_v31 = vld [vmem:[%s2101_s0 + $0x160] sm:$0xff]  ;;  %v75_v32 = vld [vmem:[%s2101_s0 + $0x168] sm:$0xff]  ;;  %v164_v35 = vpack.c.bf16 %v43_v30, %v42_v29  ;;  %v61_v37 = vld [vmem:[%s2101_s0 + $0xf8] sm:$0xff] }
  0x17   :  { %v226_v33 = vld [vmem:[%s2103_s2] sm:$0xff]  ;;  %v227_v38 = vld [vmem:[%s2103_s2 + $0x8] sm:$0xff]  ;;  %v180_v39 = vpack.c.bf16 %v75_v32, %v74_v31  ;;  %v92_v40 = vld [vmem:[%s2101_s0 + $0x1f0] sm:$0xff] }
  0x18   :  { %232 = vperm.xlu0 %1404, %v226_v33   ;;  %v93_v41 = vld [vmem:[%s2101_s0 + $0x1f8] sm:$0xff] }
  0x19   :  { %1294 = vmatpush3.bf16.xpose.msra.mxu0 %v274_v46  ;;  %v229_v42 = vld [vmem:[%s2103_s2 + $0x18] sm:$0xff] }
  0x1a   :  { %1314 = vmatpush3.bf16.xpose.msra.mxu1 %v322_v48  ;;  %1372 = vmatprep.subr.msk.bf16.mxu0 %vm260_vm0, %v169_v47 }
  0x1b   :  { %1380 = vmatprep.subr.msk.bf16.mxu1 %vm260_vm0, %v185_v49 }
  0x21   :  { %1296 = vmatpush3.bf16.xpose.msra.mxu0 %v277_v61 }
  0x22   :  { %1316 = vmatpush3.bf16.xpose.msra.mxu1 %v325_v63  ;;  %1373 = vmatprep.subr.msk.bf16.mxu0 %vm260_vm0, %v170_v62 }
  0x23   :  { %1381 = vmatprep.subr.msk.bf16.mxu1 %vm260_vm0, %v186_v0 }
  0x29   :  { %1298 = vmatpush3.bf16.xpose.msra.mxu0 %v280_v11 }
  0x2a   :  { %1318 = vmatpush3.bf16.xpose.msra.mxu1 %v328_v13  ;;  %1374 = vmatprep.subr.msk.bf16.mxu0 %vm260_vm0, %v171_v12 }
  0x2b   :  { %1382 = vmatprep.subr.msk.bf16.mxu1 %vm260_vm0, %v187_v14 }
  0x31   :  { %1300 = vmatpush3.bf16.xpose.msra.mxu0 %v283_v25 }
  0x32   :  { %1320 = vmatpush3.bf16.xpose.msra.mxu1 %v331_v27  ;;  %1375 = vmatprep.subr.msk.bf16.mxu0 %vm260_vm0, %v172_v26 }
  0x33   :  { %1383 = vmatprep.subr.msk.bf16.mxu1 %vm260_vm0, %v188_v28 }
  0x34   :  { %14 = vsyncpa [#allocation4], 0  ;;  %237 = vperm.xlu0 %1404, %v227_v38   ;;  %v286_v44 = vsel %vm260_vm0, %v164_v35, 0  ;;  %v173_v45 = vpack.c.bf16 %v61_v37, %v60_v36  ;;  %v721_v46 = vld [vmem:[%s2105_s4] sm:$0xff]  ;;  %v334_v47 = vsel %vm260_vm0, %v180_v39, 0  ;;  %v189_v48 = vpack.c.bf16 %v93_v41, %v92_v40  ;;  %v44_v49 = vld [vmem:[%s2101_s0 + $0x70] sm:$0xff]  ;;  %247 = vperm.xlu1 %1405, %v229_v42  }
  0x35   :  { %v45_v50 = vld [vmem:[%s2101_s0 + $0x78] sm:$0xff]  ;;  %v76_v51 = vld [vmem:[%s2101_s0 + $0x170] sm:$0xff]  ;;  %v722_v53 = vld [vmem:[%s2105_s4 + $0x8] sm:$0xff]  ;;  %vm738_vm1 = vcmask 261120   ;;  %vm949_vm2 = vcmask 130048  }
  0x36   :  { %v77_v52 = vld [vmem:[%s2101_s0 + $0x178] sm:$0xff]  ;;  %v165_v54 = vpack.c.bf16 %v45_v50, %v44_v49  ;;  %v939_v56 = vld [vmem:[#allocation2] sm:$0x1]  ;;  %v111_v59 = vld [vmem:[%s2101_s0 + $0x288] sm:$0xff] }
  0x37   :  { %v181_v57 = vpack.c.bf16 %v77_v52, %v76_v51  ;;  %v110_v58 = vld [vmem:[%s2101_s0 + $0x280] sm:$0xff]  ;;  %v143_v61 = vld [vmem:[%s2101_s0 + $0x388] sm:$0xff]  ;;  %v112_v8 = vld [vmem:[%s2101_s0 + $0x290] sm:$0xff] }
  0x38   :  { %725 = vperm.xlu0 %1404, %v721_v46   ;;  %730 = vperm.xlu1 %1405, %v722_v53   ;;  %v142_v60 = vld [vmem:[%s2101_s0 + $0x380] sm:$0xff]  ;;  %v289_v62 = vsel %vm260_vm0, %v165_v54, 0  ;;  %v198_v63 = vpack.c.bf16 %v111_v59, %v110_v58  ;;  %v95_v3 = vld [vmem:[%s2101_s0 + $0x208] sm:$0xff]  ;;  %v113_v9 = vld [vmem:[%s2101_s0 + $0x298] sm:$0xff] }
  0x39   :  { %1302 = vmatpush3.bf16.xpose.msra.mxu0 %v286_v44  ;;  %v337_v0 = vsel %vm260_vm0, %v181_v57, 0  ;;  %v214_v1 = vpack.c.bf16 %v143_v61, %v142_v60  ;;  %v94_v2 = vld [vmem:[%s2101_s0 + $0x200] sm:$0xff]  ;;  %v127_v5 = vld [vmem:[%s2101_s0 + $0x308] sm:$0xff]  ;;  %v144_v10 = vld [vmem:[%s2101_s0 + $0x390] sm:$0xff]  ;;  %v199_v15 = vpack.c.bf16 %v113_v9, %v112_v8 }
  0x3a   :  { %1322 = vmatpush3.bf16.xpose.msra.mxu1 %v334_v47  ;;  %1376 = vmatprep.subr.msk.bf16.mxu0 %vm260_vm0, %v173_v45  ;;  %v126_v4 = vld [vmem:[%s2101_s0 + $0x300] sm:$0xff]  ;;  %v190_v6 = vpack.c.bf16 %v95_v3, %v94_v2  ;;  %v145_v11 = vld [vmem:[%s2101_s0 + $0x398] sm:$0xff]  ;;  %v1806_v13 = vld [vmem:[%s2102_s1 + $0x8] sm:$0xff]  }
  0x3b   :  { %1384 = vmatprep.subr.msk.bf16.mxu1 %vm260_vm0, %v189_v48  ;;  %v206_v7 = vpack.c.bf16 %v127_v5, %v126_v4  ;;  %v96_v16 = vld [vmem:[%s2101_s0 + $0x210] sm:$0xff]  ;;  %v97_v17 = vld [vmem:[%s2101_s0 + $0x218] sm:$0xff]  ;;  %v215_v18 = vpack.c.bf16 %v145_v11, %v144_v10  ;;  %v114_v23 = vld [vmem:[%s2101_s0 + $0x2a0] sm:$0xff] }
  0x3c   :  { %942 = vperm.xlu0 %1404, %v939_v56   ;;  %v364_v12 = vsel %vm260_vm0, %v190_v6, 0  ;;  %v128_v19 = vld [vmem:[%s2101_s0 + $0x310] sm:$0xff]  ;;  %v129_v20 = vld [vmem:[%s2101_s0 + $0x318] sm:$0xff]  ;;  %v191_v21 = vpack.c.bf16 %v97_v17, %v96_v16  ;;  %v115_v24 = vld [vmem:[%s2101_s0 + $0x2a8] sm:$0xff] }
  0x3d   :  { %v412_v14 = vsel %vm260_vm0, %v206_v7, 0  ;;  %v207_v22 = vpack.c.bf16 %v129_v20, %v128_v19  ;;  %v146_v25 = vld [vmem:[%s2101_s0 + $0x3a0] sm:$0xff]  ;;  %v147_v26 = vld [vmem:[%s2101_s0 + $0x3a8] sm:$0xff]  ;;  %v200_v28 = vpack.c.bf16 %v115_v24, %v114_v23  ;;  %v116_v37 = vld [vmem:[%s2101_s0 + $0x2b0] sm:$0xff] }
  0x3e   :  { %v367_v27 = vsel %vm260_vm0, %v191_v21, 0  ;;  %v216_v30 = vpack.c.bf16 %v147_v26, %v146_v25  ;;  %v98_v31 = vld [vmem:[%s2101_s0 + $0x220] sm:$0xff]  ;;  %v99_v32 = vld [vmem:[%s2101_s0 + $0x228] sm:$0xff]  ;;  %v117_v38 = vld [vmem:[%s2101_s0 + $0x2b8] sm:$0xff] }
  0x3f   :  { %v415_v29 = vsel %vm260_vm0, %v207_v22, 0  ;;  %v130_v33 = vld [vmem:[%s2101_s0 + $0x320] sm:$0xff]  ;;  %v131_v34 = vld [vmem:[%s2101_s0 + $0x328] sm:$0xff]  ;;  %v192_v35 = vpack.c.bf16 %v99_v32, %v98_v31  ;;  %v148_v39 = vld [vmem:[%s2101_s0 + $0x3b0] sm:$0xff]  ;;  %v201_v42 = vpack.c.bf16 %v117_v38, %v116_v37 }
  0x40   :  { %v208_v36 = vpack.c.bf16 %v131_v34, %v130_v33  ;;  %v149_v40 = vld [vmem:[%s2101_s0 + $0x3b8] sm:$0xff]  ;;  %v100_v46 = vld [vmem:[%s2101_s0 + $0x230] sm:$0xff]  ;;  %v118_v52 = vld [vmem:[%s2101_s0 + $0x2c0] sm:$0xff] }
  0x41   :  { %1304 = vmatpush3.bf16.xpose.msra.mxu0 %v289_v62  ;;  %v370_v41 = vsel %vm260_vm0, %v192_v35, 0  ;;  %v217_v45 = vpack.c.bf16 %v149_v40, %v148_v39  ;;  %v101_v47 = vld [vmem:[%s2101_s0 + $0x238] sm:$0xff]  ;;  %v132_v48 = vld [vmem:[%s2101_s0 + $0x330] sm:$0xff]  ;;  %v119_v53 = vld [vmem:[%s2101_s0 + $0x2c8] sm:$0xff] }
  0x42   :  { %1324 = vmatpush3.bf16.xpose.msra.mxu1 %v337_v0  ;;  %1385 = vmatprep.subr.msk.bf16.mxu0 %vm260_vm0, %v198_v63  ;;  %v418_v44 = vsel %vm260_vm0, %v208_v36, 0  ;;  %v133_v49 = vld [vmem:[%s2101_s0 + $0x338] sm:$0xff]  ;;  %v193_v50 = vpack.c.bf16 %v101_v47, %v100_v46  ;;  %v150_v54 = vld [vmem:[%s2101_s0 + $0x3c0] sm:$0xff]  ;;  %v151_v56 = vld [vmem:[%s2101_s0 + $0x3c8] sm:$0xff]  ;;  %v202_v58 = vpack.c.bf16 %v119_v53, %v118_v52 }
  0x43   :  { %1393 = vmatprep.subr.msk.bf16.mxu1 %vm260_vm0, %v214_v1  ;;  %v209_v51 = vpack.c.bf16 %v133_v49, %v132_v48  ;;  %v218_v60 = vpack.c.bf16 %v151_v56, %v150_v54  ;;  %v102_v61 = vld [vmem:[%s2101_s0 + $0x240] sm:$0xff]  ;;  %v103_v62 = vld [vmem:[%s2101_s0 + $0x248] sm:$0xff]  ;;  %v120_v3 = vld [vmem:[%s2101_s0 + $0x2d0] sm:$0xff] }
  0x44   :  { %v373_v57 = vsel %vm260_vm0, %v193_v50, 0  ;;  %v134_v63 = vld [vmem:[%s2101_s0 + $0x340] sm:$0xff]  ;;  %v135_v0 = vld [vmem:[%s2101_s0 + $0x348] sm:$0xff]  ;;  %v194_v1 = vpack.c.bf16 %v103_v62, %v102_v61  ;;  %v121_v4 = vld [vmem:[%s2101_s0 + $0x2d8] sm:$0xff] }
  0x45   :  { %v421_v59 = vsel %vm260_vm0, %v209_v51, 0  ;;  %v210_v2 = vpack.c.bf16 %v135_v0, %v134_v63  ;;  %v152_v5 = vld [vmem:[%s2101_s0 + $0x3d0] sm:$0xff]  ;;  %v153_v6 = vld [vmem:[%s2101_s0 + $0x3d8] sm:$0xff]  ;;  %v203_v8 = vpack.c.bf16 %v121_v4, %v120_v3  ;;  %v123_v19 = vld [vmem:[%s2101_s0 + $0x2e8] sm:$0xff] }
  0x46   :  { %v376_v7 = vsel %vm260_vm0, %v194_v1, 0  ;;  %v219_v10 = vpack.c.bf16 %v153_v6, %v152_v5  ;;  %v104_v11 = vld [vmem:[%s2101_s0 + $0x250] sm:$0xff]  ;;  %v154_v20 = vld [vmem:[%s2101_s0 + $0x3e0] sm:$0xff]  ;;  %v155_v21 = vld [vmem:[%s2101_s0 + $0x3e8] sm:$0xff] }
  0x47   :  { %v424_v9 = vsel %vm260_vm0, %v210_v2, 0  ;;  %v220_v25 = vpack.c.bf16 %v155_v21, %v154_v20  ;;  %v106_v26 = vld [vmem:[%s2101_s0 + $0x260] sm:$0xff]  ;;  %v124_v32 = vld [vmem:[%s2101_s0 + $0x2f0] sm:$0xff]  ;;  %v125_v33 = vld [vmem:[%s2101_s0 + $0x2f8] sm:$0xff] }
  0x48   :  { %1306 = vmatmul.mubr.msk.bf16.vlgmr.msra.gmra.mrb[0].mxu0 %vm260_vm0, %v1625_v55  ;;  %v156_v34 = vld [vmem:[%s2101_s0 + $0x3f0] sm:$0xff]  ;;  %v157_v35 = vld [vmem:[%s2101_s0 + $0x3f8] sm:$0xff]  ;;  %v205_v37 = vpack.c.bf16 %v125_v33, %v124_v32 }
  0x49   :  { %1326 = vmatmul.mubr.msk.bf16.vlgmr.msra.gmra.mrb[0].mxu1 %vm260_vm0, %v1625_v55  ;;  %1330 = vmatpush3.bf16.xpose.msra.mxu0 %v364_v12  ;;  %v105_v12 = vld [vmem:[%s2101_s0 + $0x258] sm:$0xff]  ;;  %v221_v39 = vpack.c.bf16 %v157_v35, %v156_v34  ;;  %v108_v40 = vld [vmem:[%s2101_s0 + $0x270] sm:$0xff] }
  0x4a   :  { %1350 = vmatpush3.bf16.xpose.msra.mxu1 %v412_v14  ;;  %1307 = vmatprep.mubr.msk.bf16.mxu0 %vm260_vm0, %v1806_v13  ;;  %v136_v14 = vld [vmem:[%s2101_s0 + $0x350] sm:$0xff]  ;;  %v195_v16 = vpack.c.bf16 %v105_v12, %v104_v11 }
  0x4b   :  { %1327 = vmatprep.mubr.msk.bf16.mxu1 %vm260_vm0, %v1806_v13  ;;  %1386 = vmatprep.subr.msk.bf16.mxu0 %vm260_vm0, %v199_v15  ;;  %v137_v15 = vld [vmem:[%s2101_s0 + $0x358] sm:$0xff] }
  0x4c   :  { %1394 = vmatprep.subr.msk.bf16.mxu1 %vm260_vm0, %v215_v18  ;;  %v211_v17 = vpack.c.bf16 %v137_v15, %v136_v14  ;;  %v122_v18 = vld [vmem:[%s2101_s0 + $0x2e0] sm:$0xff]  ;;  %v379_v22 = vsel %vm260_vm0, %v195_v16, 0 }
  0x4d   :  { %v204_v23 = vpack.c.bf16 %v123_v19, %v122_v18 }
  0x4e   :  { %v427_v24 = vsel %vm260_vm0, %v211_v17, 0 }
  0x50   :  { %1308 = vmatmul.mubr.msk.bf16.gmra.mrb[4].mxu0 %vm260_vm0, %v1806_v13 }
  0x51   :  { %1328 = vmatmul.mubr.msk.bf16.gmra.mrb[4].mxu1 %vm260_vm0, %v1806_v13  ;;  %1332 = vmatpush3.bf16.xpose.msra.mxu0 %v367_v27  ;;  %v107_v27 = vld [vmem:[%s2101_s0 + $0x268] sm:$0xff] }
  0x52   :  { %1352 = vmatpush3.bf16.xpose.msra.mxu1 %v415_v29  ;;  %1387 = vmatprep.subr.msk.bf16.mxu0 %vm260_vm0, %v200_v28  ;;  %v138_v28 = vld [vmem:[%s2101_s0 + $0x360] sm:$0xff]  ;;  %v139_v29 = vld [vmem:[%s2101_s0 + $0x368] sm:$0xff] }
  0x53   :  { %1395 = vmatprep.subr.msk.bf16.mxu1 %vm260_vm0, %v216_v30  ;;  %1345 = vmatprep.mubr.msk.bf16.mxu0 %vm260_vm0, %v1625_v55  ;;  %v196_v30 = vpack.c.bf16 %v107_v27, %v106_v26  ;;  %v212_v31 = vpack.c.bf16 %v139_v29, %v138_v28 }
  0x54   :  { %1365 = vmatprep.mubr.msk.bf16.mxu1 %vm260_vm0, %v1625_v55 }
  0x55   :  { %v382_v36 = vsel %vm260_vm0, %v196_v30, 0  ;;  %v430_v38 = vsel %vm260_vm0, %v212_v31, 0 }
  0x59   :  { %1334 = vmatpush3.bf16.xpose.msra.mxu0 %v370_v41  ;;  %v109_v41 = vld [vmem:[%s2101_s0 + $0x278] sm:$0xff] }
  0x5a   :  { %1354 = vmatpush3.bf16.xpose.msra.mxu1 %v418_v44  ;;  %1388 = vmatprep.subr.msk.bf16.mxu0 %vm260_vm0, %v201_v42  ;;  %v140_v42 = vld [vmem:[%s2101_s0 + $0x370] sm:$0xff]  ;;  %v141_v44 = vld [vmem:[%s2101_s0 + $0x378] sm:$0xff] }
  0x5b   :  { %1396 = vmatprep.subr.msk.bf16.mxu1 %vm260_vm0, %v217_v45  ;;  %v197_v45 = vpack.c.bf16 %v109_v41, %v108_v40  ;;  %v213_v46 = vpack.c.bf16 %v141_v44, %v140_v42 }
  0x5d   :  { %v385_v47 = vsel %vm260_vm0, %v197_v45, 0  ;;  %v433_v48 = vsel %vm260_vm0, %v213_v46, 0  ;;  %v2050_v46 = vld [vmem:[%s2104_s3] sm:$0xff]  }
  0x61   :  { %1336 = vmatpush3.bf16.xpose.msra.mxu0 %v373_v57 }
  0x62   :  { %1356 = vmatpush3.bf16.xpose.msra.mxu1 %v421_v59  ;;  %1389 = vmatprep.subr.msk.bf16.mxu0 %vm260_vm0, %v202_v58 }
  0x63   :  { %1397 = vmatprep.subr.msk.bf16.mxu1 %vm260_vm0, %v218_v60 }
  0x69   :  { %1338 = vmatpush3.bf16.xpose.msra.mxu0 %v376_v7 }
  0x6a   :  { %1358 = vmatpush3.bf16.xpose.msra.mxu1 %v424_v9  ;;  %1390 = vmatprep.subr.msk.bf16.mxu0 %vm260_vm0, %v203_v8 }
  0x6b   :  { %1398 = vmatprep.subr.msk.bf16.mxu1 %vm260_vm0, %v219_v10 }
  0x71   :  { %1340 = vmatpush3.bf16.xpose.msra.mxu0 %v379_v22 }
  0x72   :  { %1360 = vmatpush3.bf16.xpose.msra.mxu1 %v427_v24  ;;  %1391 = vmatprep.subr.msk.bf16.mxu0 %vm260_vm0, %v204_v23 }
  0x73   :  { %1399 = vmatprep.subr.msk.bf16.mxu1 %vm260_vm0, %v220_v25 }
  0x79   :  { %1342 = vmatpush3.bf16.xpose.msra.mxu0 %v382_v36 }
  0x7a   :  { %1362 = vmatpush3.bf16.xpose.msra.mxu1 %v430_v38  ;;  %1392 = vmatprep.subr.msk.bf16.mxu0 %vm260_vm0, %v205_v37 }
  0x7b   :  { %1400 = vmatprep.subr.msk.bf16.mxu1 %vm260_vm0, %v221_v39 }
  0x81   :  { %1344 = vmatpush3.bf16.xpose.msra.mxu0 %v385_v47 }
  0x82   :  { %1364 = vmatpush3.bf16.xpose.msra.mxu1 %v433_v48 }
  0x88   :  { %1346 = vmatmul.mubr.msk.bf16.vlgmr.msra.gmra.mrb[8].mxu0 %vm260_vm0, %v1625_v55 }
  0x89   :  { %1366 = vmatmul.mubr.msk.bf16.vlgmr.msra.gmra.mrb[8].mxu1 %vm260_vm0, %v1625_v55  ;;  %1347 = vmatprep.mubr.msk.bf16.mxu0 %vm260_vm0, %v1806_v13 }
  0x8a   :  { %1367 = vmatprep.mubr.msk.bf16.mxu1 %vm260_vm0, %v1806_v13 }
  0x90   :  { %1348 = vmatmul.mubr.msk.bf16.gmra.mrb[12].mxu0 %vm260_vm0, %v1806_v13 }
  0x91   :  { %1368 = vmatmul.mubr.msk.bf16.gmra.mrb[12].mxu1 %vm260_vm0, %v1806_v13  ;;  %774 = vmatprep.mubr.bf16.mxu0 %v1465_v43 }
  0x92   :  { %817 = vmatprep.mubr.bf16.mxu1 %v1465_v43 }
  0x94   :  { %v2025_v50 = vpop.permute.xlu1 %242 }
  0x97   :  { %v2023_v49 = vpop.permute.xlu0 %232 }
  0xb3   :  { %v2027_v51 = vpop.permute.xlu0 %237  ;;  %v2037_v16 = vpop.permute.xlu1 %247 }
 0x11b   :  { %v493_v55 = vpop.f32.mrb[0].mxu0 }
 0x11c   :  { %v494_v52 = vadd.f32 %v493_v55, %v2023_v49  ;;  %v546_v53 = vpop.f32.mrb[0].mxu1  ;;  %v495_v54 = vpop.f32.mrb[1].mxu0 }
 0x11d   :  { %v547_v56 = vadd.f32 %v546_v53, %v2023_v49  ;;  %v496_v57 = vadd.f32 %v495_v54, %v2023_v49  ;;  %v548_v13 = vpop.f32.mrb[1].mxu1  ;;  %v497_v58 = vpop.f32.mrb[2].mxu0 }
 0x11e   :  { %v671_v59 = vmax.f32 %v494_v52, 0.0  ;;  %v549_v60 = vadd.f32 %v548_v13, %v2023_v49  ;;  %v498_v61 = vadd.f32 %v497_v58, %v2027_v51  ;;  %v550_v62 = vpop.f32.mrb[2].mxu1  ;;  %v499_v63 = vpop.f32.mrb[3].mxu0 }
 0x11f   :  { %v673_v0 = vmax.f32 %v547_v56, 0.0  ;;  %v551_v1 = vadd.f32 %v550_v62, %v2027_v51  ;;  %v500_v2 = vadd.f32 %v499_v63, %v2027_v51  ;;  %v552_v3 = vpop.f32.mrb[3].mxu1  ;;  %v672_v6 = vmax.f32 %v496_v57, 0.0 }
 0x120   :  { %v679_v4 = vmax.f32 %v498_v61, 0.0  ;;  %v553_v5 = vadd.f32 %v552_v3, %v2027_v51  ;;  %v674_v9 = vmax.f32 %v549_v60, 0.0 }
 0x121   :  { %v681_v7 = vmax.f32 %v551_v1, 0.0  ;;  %v680_v8 = vmax.f32 %v500_v2, 0.0 }
 0x122   :  { %v705_v10 = vpack.c.bf16 %v679_v4, %v671_v59  ;;  %v682_v11 = vmax.f32 %v553_v5, 0.0 }
 0x123   :  { %v707_v12 = vpack.c.bf16 %v681_v7, %v673_v0  ;;  %v706_v14 = vpack.c.bf16 %v680_v8, %v672_v6  ;;  %v503_v15 = vpop.f32.mrb[4].mxu0 }
 0x124   :  { %v708_v17 = vpack.c.bf16 %v682_v11, %v674_v9  ;;  %v504_v18 = vadd.f32 %v503_v15, %v2025_v50  ;;  %v556_v19 = vpop.f32.mrb[4].mxu1  ;;  %v505_v20 = vpop.f32.mrb[5].mxu0 }
 0x125   :  { %v557_v21 = vadd.f32 %v556_v19, %v2025_v50  ;;  %v506_v22 = vadd.f32 %v505_v20, %v2025_v50  ;;  %v558_v23 = vpop.f32.mrb[5].mxu1  ;;  %v507_v24 = vpop.f32.mrb[6].mxu0  ;;  %742 = vmatprep.subr.bf16.mxu0 %v706_v14 }
 0x126   :  { %v687_v25 = vmax.f32 %v504_v18, 0.0  ;;  %v559_v26 = vadd.f32 %v558_v23, %v2025_v50  ;;  %v560_v27 = vpop.f32.mrb[6].mxu1  ;;  %785 = vmatprep.subr.bf16.mxu1 %v708_v17  ;;  %v509_v28 = vpop.f32.mrb[7].mxu0  ;;  %743 = vmatpush1.bf16.msra.mxu0 %v705_v10  ;;  %v508_v29 = vadd.f32 %v507_v24, %v2037_v16 }
 0x127   :  { %v689_v30 = vmax.f32 %v557_v21, 0.0  ;;  %v688_v31 = vmax.f32 %v506_v22, 0.0  ;;  %v510_v32 = vadd.f32 %v509_v28, %v2037_v16  ;;  %v562_v33 = vpop.f32.mrb[7].mxu1  ;;  %786 = vmatpush1.bf16.msra.mxu1 %v707_v12  ;;  %v561_v34 = vadd.f32 %v560_v27, %v2037_v16 }
 0x128   :  { %v690_v35 = vmax.f32 %v559_v26, 0.0  ;;  %v563_v36 = vadd.f32 %v562_v33, %v2037_v16  ;;  %v695_v37 = vmax.f32 %v508_v29, 0.0 }
 0x129   :  { %v696_v38 = vmax.f32 %v510_v32, 0.0  ;;  %v697_v39 = vmax.f32 %v561_v34, 0.0 }
 0x12a   :  { %v698_v40 = vmax.f32 %v563_v36, 0.0  ;;  %v713_v41 = vpack.c.bf16 %v695_v37, %v687_v25 }
 0x12b   :  { %v714_v42 = vpack.c.bf16 %v696_v38, %v688_v31  ;;  %v715_v44 = vpack.c.bf16 %v697_v39, %v689_v30 }
 0x12c   :  { %v716_v45 = vpack.c.bf16 %v698_v40, %v690_v35  ;;  %v731_v40 = vpop.permute.xlu1 %730 }
 0x12d   :  { %744 = vmatprep.subr.bf16.mxu0 %v714_v42 }
 0x12e   :  { %787 = vmatprep.subr.bf16.mxu1 %v716_v45  ;;  %745 = vmatpush1.bf16.msra.mxu0 %v713_v41 }
 0x12f   :  { %788 = vmatpush1.bf16.msra.mxu1 %v715_v44 }
 0x131   :  { %1265 = vmatmul.mubr.msk.bf16.vlgmr.msra.gmra.mrb[16].mxu0 %vm738_vm1, %v2050_v46 }
 0x132   :  { %1266 = vmatmul.mubr.msk.bf16.vlgmr.msra.gmra.mrb[16].mxu1 %vm738_vm1, %v2050_v46  ;;  %860 = vmatprep.mubr.bf16.mxu0 %v1465_v43 }
 0x133   :  { %903 = vmatprep.mubr.bf16.mxu1 %v1465_v43 }
 0x15b   :  { %v599_v47 = vpop.f32.mrb[8].mxu0 }
 0x15c   :  { %v600_v48 = vadd.f32 %v599_v47, %v2023_v49  ;;  %v652_v55 = vpop.f32.mrb[8].mxu1  ;;  %v601_v52 = vpop.f32.mrb[9].mxu0 }
 0x15d   :  { %v653_v53 = vadd.f32 %v652_v55, %v2023_v49  ;;  %v602_v54 = vadd.f32 %v601_v52, %v2023_v49  ;;  %v654_v56 = vpop.f32.mrb[9].mxu1  ;;  %v603_v57 = vpop.f32.mrb[10].mxu0 }
 0x15e   :  { %v655_v13 = vadd.f32 %v654_v56, %v2023_v49  ;;  %v604_v58 = vadd.f32 %v603_v57, %v2027_v51  ;;  %v656_v59 = vpop.f32.mrb[10].mxu1  ;;  %v605_v60 = vpop.f32.mrb[11].mxu0  ;;  %v675_v0 = vmax.f32 %v600_v48, 0.0 }
 0x15f   :  { %v657_v61 = vadd.f32 %v656_v59, %v2027_v51  ;;  %v606_v62 = vadd.f32 %v605_v60, %v2027_v51  ;;  %v658_v63 = vpop.f32.mrb[11].mxu1  ;;  %v677_v3 = vmax.f32 %v653_v53, 0.0  ;;  %v676_v4 = vmax.f32 %v602_v54, 0.0 }
 0x160   :  { %v683_v1 = vmax.f32 %v604_v58, 0.0  ;;  %v659_v2 = vadd.f32 %v658_v63, %v2027_v51  ;;  %v678_v7 = vmax.f32 %v655_v13, 0.0 }
 0x161   :  { %v685_v5 = vmax.f32 %v657_v61, 0.0  ;;  %v684_v6 = vmax.f32 %v606_v62, 0.0 }
 0x162   :  { %v709_v8 = vpack.c.bf16 %v683_v1, %v675_v0  ;;  %v686_v49 = vmax.f32 %v659_v2, 0.0 }
 0x163   :  { %v711_v9 = vpack.c.bf16 %v685_v5, %v677_v3  ;;  %v710_v10 = vpack.c.bf16 %v684_v6, %v676_v4  ;;  %v609_v11 = vpop.f32.mrb[12].mxu0 }
 0x164   :  { %v712_v12 = vpack.c.bf16 %v686_v49, %v678_v7  ;;  %v610_v14 = vadd.f32 %v609_v11, %v2025_v50  ;;  %v662_v15 = vpop.f32.mrb[12].mxu1  ;;  %v611_v17 = vpop.f32.mrb[13].mxu0 }
 0x165   :  { %v663_v18 = vadd.f32 %v662_v15, %v2025_v50  ;;  %v612_v19 = vadd.f32 %v611_v17, %v2025_v50  ;;  %v664_v51 = vpop.f32.mrb[13].mxu1  ;;  %v613_v20 = vpop.f32.mrb[14].mxu0  ;;  %828 = vmatprep.subr.bf16.mxu0 %v710_v10 }
 0x166   :  { %v665_v21 = vadd.f32 %v664_v51, %v2025_v50  ;;  %v614_v22 = vadd.f32 %v613_v20, %v2037_v16  ;;  %v666_v23 = vpop.f32.mrb[14].mxu1  ;;  %871 = vmatprep.subr.bf16.mxu1 %v712_v12  ;;  %v615_v24 = vpop.f32.mrb[15].mxu0  ;;  %829 = vmatpush1.bf16.msra.mxu0 %v709_v8  ;;  %v691_v28 = vmax.f32 %v610_v14, 0.0  ;;  %v930_v8 = vld [vmem:[%s2106_s5] sm:$0x1]  ;;  %s1467_s5 = smov [#allocation3]  }
 0x167   :  { %v667_v25 = vadd.f32 %v666_v23, %v2037_v16  ;;  %v616_v26 = vadd.f32 %v615_v24, %v2037_v16  ;;  %v668_v27 = vpop.f32.mrb[15].mxu1  ;;  %872 = vmatpush1.bf16.msra.mxu1 %v711_v9  ;;  %v693_v31 = vmax.f32 %v663_v18, 0.0  ;;  %v692_v32 = vmax.f32 %v612_v19, 0.0  ;;  %s1246_s21 = sshll.u32 %s1467_s5, 4  ;;  %s1247_s21 = int_to_ptr.vmem [resolvable:$true] %s1246_s21 }
 0x168   :  { %v699_v29 = vmax.f32 %v614_v22, 0.0  ;;  %v669_v30 = vadd.f32 %v668_v27, %v2037_v16  ;;  %v694_v34 = vmax.f32 %v665_v21, 0.0  ;;  %v726_v16 = vpop.permute.xlu0 %725  ;;  %s1441_s22 = scalar_lea.vmem %s1247_s21, 128  ;;  %p1446_p1 = scmp.lt.s32.totalorder %s1247_s21, %s1247_s21 }
 0x169   :  { %v701_v33 = vmax.f32 %v667_v25, 0.0  ;;  %v700_v50 = vmax.f32 %v616_v26, 0.0  ;;  %p1442_p0 = scmp.ne.s32.totalorder %s1247_s21, %s1441_s22  ;;  %p1447_p2 = scmp.lt.s32.totalorder %s1441_s22, %s1441_s22 }
 0x16a   :  { %v717_v35 = vpack.c.bf16 %v699_v29, %v691_v28  ;;  %v702_v36 = vmax.f32 %v669_v30, 0.0 }
 0x16b   :  { %v719_v37 = vpack.c.bf16 %v701_v33, %v693_v31  ;;  %v718_v38 = vpack.c.bf16 %v700_v50, %v692_v32  ;;  %p1448_p3 = por %p1447_p2, %p1446_p1 }
 0x16c   :  { %v720_v39 = vpack.c.bf16 %v702_v36, %v694_v34 }
 0x16d   :  { %830 = vmatprep.subr.bf16.mxu0 %v718_v38  ;;  %v943_v38 = vpop.permute.xlu0 %942  ;;  %p1449_p4 = pnand %p1448_p3, %p1442_p0 }
 0x16e   :  { %873 = vmatprep.subr.bf16.mxu1 %v720_v39  ;;  %831 = vmatpush1.bf16.msra.mxu0 %v717_v35  ;;  %v945_v35 = vlaneseq }
 0x16f   :  { %874 = vmatpush1.bf16.msra.mxu1 %v719_v37 }
 0x170   :  { %v946_v36 = vshrl.u32 %v945_v35, 7 }
 0x171   :  { %1267 = vmatmul.mubr.msk.bf16.vlgmr.msra.gmra.mrb[20].mxu0 %vm738_vm1, %v2050_v46 }
 0x172   :  { %1268 = vmatmul.mubr.msk.bf16.vlgmr.msra.gmra.mrb[20].mxu1 %vm738_vm1, %v2050_v46  ;;  %985 = vmatprep.mubr.bf16.mxu0 %v1465_v43  ;;  %v947_v37 = vsub.s32 0, %v946_v36 }
 0x173   :  { %1026 = vmatprep.mubr.bf16.mxu1 %v1465_v43 }
 0x174   :  { %v948_v39 = vrot.slane %v943_v38, %v947_v37 }
 0x204   :  { %v776_v41 = vpop.f32.mrb[16].mxu0 }
 0x205   :  { %v777_v42 = vadd.f32 %v776_v41, %v726_v16  ;;  %v819_v44 = vpop.f32.mrb[16].mxu1  ;;  %v778_v45 = vpop.f32.mrb[17].mxu0 }
 0x206   :  { %v820_v47 = vadd.f32 %v819_v44, %v726_v16  ;;  %v779_v48 = vadd.f32 %v778_v45, %v726_v16  ;;  %v821_v55 = vpop.f32.mrb[17].mxu1  ;;  %v780_v52 = vpop.f32.mrb[18].mxu0 }
 0x207   :  { %v822_v53 = vadd.f32 %v821_v55, %v726_v16  ;;  %v781_v54 = vadd.f32 %v780_v52, %v731_v40  ;;  %v823_v56 = vpop.f32.mrb[18].mxu1  ;;  %v782_v57 = vpop.f32.mrb[19].mxu0  ;;  %v914_v59 = vmax.f32 %v777_v42, 0.0 }
 0x208   :  { %v824_v13 = vadd.f32 %v823_v56, %v731_v40  ;;  %v783_v46 = vadd.f32 %v782_v57, %v731_v40  ;;  %v825_v58 = vpop.f32.mrb[19].mxu1  ;;  %v916_v62 = vmax.f32 %v820_v47, 0.0  ;;  %v915_v63 = vmax.f32 %v779_v48, 0.0 }
 0x209   :  { %v922_v60 = vmax.f32 %v781_v54, 0.0  ;;  %v826_v61 = vadd.f32 %v825_v58, %v731_v40  ;;  %v917_v2 = vmax.f32 %v822_v53, 0.0 }
 0x20a   :  { %v924_v0 = vmax.f32 %v824_v13, 0.0  ;;  %v923_v1 = vmax.f32 %v783_v46, 0.0 }
 0x20b   :  { %v931_v3 = vpack.c.bf16 %v922_v60, %v914_v59  ;;  %v925_v4 = vmax.f32 %v826_v61, 0.0 }
 0x20c   :  { %v933_v5 = vpack.c.bf16 %v924_v0, %v916_v62  ;;  %v932_v6 = vpack.c.bf16 %v923_v1, %v915_v63 }
 0x20d   :  { %v934_v7 = vpack.c.bf16 %v925_v4, %v917_v2 }
 0x20e   :  { %953 = vmatprep.subr.bf16.mxu0 %v932_v6  ;;  %v1466_v6 = vmov 1966171168  }
 0x20f   :  { %994 = vmatprep.subr.bf16.mxu1 %v934_v7  ;;  %954 = vmatpush1.bf16.msra.mxu0 %v931_v3  ;;  %v1194_v7 = vunpack.c.l.s4 %v1466_v6 }
 0x210   :  { %995 = vmatpush1.bf16.msra.mxu1 %v933_v5 }
 0x212   :  { %1269 = vmatmul.mubr.msk.bf16.vlgmr.msra.gmra.mrb[24].mxu0 %vm949_vm2, %v930_v8 }
 0x213   :  { %1270 = vmatmul.mubr.msk.bf16.vlgmr.msra.gmra.mrb[24].mxu1 %vm949_vm2, %v930_v8  ;;  %1067 = vmatprep.mubr.bf16.mxu0 %v1465_v43 }
 0x214   :  { %1108 = vmatprep.mubr.bf16.mxu1 %v1465_v43 }
 0x244   :  { %v862_v49 = vpop.f32.mrb[20].mxu0 }
 0x245   :  { %v863_v9 = vadd.f32 %v862_v49, %v726_v16  ;;  %v905_v10 = vpop.f32.mrb[20].mxu1  ;;  %v864_v11 = vpop.f32.mrb[21].mxu0 }
 0x246   :  { %v906_v12 = vadd.f32 %v905_v10, %v726_v16  ;;  %v865_v14 = vadd.f32 %v864_v11, %v726_v16  ;;  %v907_v15 = vpop.f32.mrb[21].mxu1  ;;  %v866_v17 = vpop.f32.mrb[22].mxu0 }
 0x247   :  { %v908_v18 = vadd.f32 %v907_v15, %v726_v16  ;;  %v867_v19 = vadd.f32 %v866_v17, %v731_v40  ;;  %v909_v51 = vpop.f32.mrb[22].mxu1  ;;  %v868_v20 = vpop.f32.mrb[23].mxu0  ;;  %v918_v24 = vmax.f32 %v863_v9, 0.0 }
 0x248   :  { %v910_v21 = vadd.f32 %v909_v51, %v731_v40  ;;  %v869_v22 = vadd.f32 %v868_v20, %v731_v40  ;;  %v911_v23 = vpop.f32.mrb[23].mxu1  ;;  %v920_v27 = vmax.f32 %v906_v12, 0.0  ;;  %v919_v43 = vmax.f32 %v865_v14, 0.0 }
 0x249   :  { %v926_v25 = vmax.f32 %v867_v19, 0.0  ;;  %v912_v26 = vadd.f32 %v911_v23, %v731_v40  ;;  %v921_v30 = vmax.f32 %v908_v18, 0.0 }
 0x24a   :  { %v928_v28 = vmax.f32 %v910_v21, 0.0  ;;  %v927_v29 = vmax.f32 %v869_v22, 0.0 }
 0x24b   :  { %v935_v31 = vpack.c.bf16 %v926_v25, %v918_v24  ;;  %v929_v32 = vmax.f32 %v912_v26, 0.0 }
 0x24c   :  { %v937_v33 = vpack.c.bf16 %v928_v28, %v920_v27  ;;  %v936_v50 = vpack.c.bf16 %v927_v29, %v919_v43 }
 0x24d   :  { %v938_v34 = vpack.c.bf16 %v929_v32, %v921_v30 }
 0x24e   :  { %1035 = vmatprep.subr.bf16.mxu0 %v936_v50 }
 0x24f   :  { %1076 = vmatprep.subr.bf16.mxu1 %v938_v34  ;;  %1036 = vmatpush1.bf16.msra.mxu0 %v935_v31 }
 0x250   :  { %1077 = vmatpush1.bf16.msra.mxu1 %v937_v33 }
 0x252   :  { %1271 = vmatmul.mubr.msk.bf16.vlgmr.msra.gmra.mrb[28].mxu0 %vm949_vm2, %v930_v8 }
 0x253   :  { %1272 = vmatmul.mubr.msk.bf16.vlgmr.msra.gmra.mrb[28].mxu1 %vm949_vm2, %v930_v8  ;;  %v1195_v8 = vunpack.c.0.s8 %v1194_v7 }
 0x255   :  { %v1198_v10 = vsub.s32 %v1195_v8, %v946_v36 }
 0x2e5   :  { %v987_v16 = vpop.f32.mrb[24].mxu0 }
 0x2e6   :  { %v988_v40 = vadd.f32 %v987_v16, %v948_v39  ;;  %v1028_v41 = vpop.f32.mrb[24].mxu1  ;;  %v989_v42 = vpop.f32.mrb[25].mxu0 }
 0x2e7   :  { %v1029_v44 = vadd.f32 %v1028_v41, %v948_v39  ;;  %v990_v45 = vadd.f32 %v989_v42, %v948_v39  ;;  %v1030_v47 = vpop.f32.mrb[25].mxu1  ;;  %v991_v48 = vpop.f32.mrb[26].mxu0 }
 0x2e8   :  { %v1273_v55 = vclamps-f32 %v988_v40, 1e+10  ;;  %v1031_v52 = vadd.f32 %v1030_v47, %v948_v39  ;;  %v1032_v53 = vpop.f32.mrb[26].mxu1  ;;  %v992_v54 = vpop.f32.mrb[27].mxu0 }
 0x2e9   :  { %v1275_v56 = vclamps-f32 %v1029_v44, 1e+10  ;;  %v1274_v57 = vclamps-f32 %v990_v45, 1e+10  ;;  %v1033_v13 = vpop.f32.mrb[27].mxu1 }
 0x2ea   :  { %v1281_v46 = vmul.f32 -1.442695, %v1273_v55  ;;  %v1276_v58 = vclamps-f32 %v1031_v52, 1e+10 }
 0x2eb   :  { %v1283_v59 = vmul.f32 -1.442695, %v1275_v56  ;;  %v1282_v60 = vmul.f32 -1.442695, %v1274_v57 }
 0x2ec   :  { %1409 = vpow2.f32 %v1281_v46  ;;  %v1284_v61 = vmul.f32 -1.442695, %v1276_v58 }
 0x2ed   :  { %1411 = vpow2.f32 %v1283_v59 }
 0x2ee   :  { %1413 = vpow2.f32 %v1282_v60 }
 0x2ef   :  { %1415 = vpow2.f32 %v1284_v61 }
 0x2f6   :  { %v1410_v62 = vpop.eup %1409 }
 0x2f7   :  { %v1412_v63 = vpop.eup %1411  ;;  %v1157_v0 = vadd.f32 1.0, %v1410_v62 }
 0x2f8   :  { %v1414_v1 = vpop.eup %1413  ;;  %v1159_v2 = vadd.f32 1.0, %v1412_v63 }
 0x2f9   :  { %v1416_v3 = vpop.eup %1415  ;;  %1417 = vrcp.f32 %v1157_v0  ;;  %v1158_v4 = vadd.f32 1.0, %v1414_v1 }
 0x2fa   :  { %1419 = vrcp.f32 %v1159_v2  ;;  %v1160_v5 = vadd.f32 1.0, %v1416_v3 }
 0x2fb   :  { %1421 = vrcp.f32 %v1158_v4 }
 0x2fc   :  { %1423 = vrcp.f32 %v1160_v5 }
 0x303   :  { %v1418_v49 = vpop.eup %1417 }
 0x304   :  { %v1420_v9 = vpop.eup %1419 }
 0x305   :  { %v1422_v11 = vpop.eup %1421 }
 0x306   :  { %v1424_v12 = vpop.eup %1423  ;;  %v1189_v14 = vcombine.low %v1418_v49, %v1422_v11 }
 0x307   :  { %v1190_v15 = vcombine.low %v1420_v9, %v1424_v12 }
 0x308   :  { %v1199_v17 = vrot.slane %v1189_v14, %v1198_v10 }
 0x309   :  { %v1206_v18 = vrot.slane %v1190_v15, %v1198_v10 }
 0x30b   :  { %v1221_v19 = vcombine.low %v1199_v17, %v1206_v18 }
 0x30d   :  { %v1229_v13 = vrot.slane %v1221_v19, %v1198_v10 }
 0x325   :  { %v1069_v51 = vpop.f32.mrb[28].mxu0 }
 0x326   :  { %v1070_v20 = vadd.f32 %v1069_v51, %v948_v39  ;;  %v1110_v21 = vpop.f32.mrb[28].mxu1  ;;  %v1071_v22 = vpop.f32.mrb[29].mxu0 }
 0x327   :  { %v1111_v23 = vadd.f32 %v1110_v21, %v948_v39  ;;  %v1072_v24 = vadd.f32 %v1071_v22, %v948_v39  ;;  %v1112_v25 = vpop.f32.mrb[29].mxu1  ;;  %v1073_v26 = vpop.f32.mrb[30].mxu0 }
 0x328   :  { %v1277_v27 = vclamps-f32 %v1070_v20, 1e+10  ;;  %v1113_v43 = vadd.f32 %v1112_v25, %v948_v39  ;;  %v1114_v28 = vpop.f32.mrb[30].mxu1  ;;  %v1074_v29 = vpop.f32.mrb[31].mxu0 }
 0x329   :  { %v1279_v30 = vclamps-f32 %v1111_v23, 1e+10  ;;  %v1278_v31 = vclamps-f32 %v1072_v24, 1e+10  ;;  %v1115_v32 = vpop.f32.mrb[31].mxu1 }
 0x32a   :  { %v1285_v33 = vmul.f32 -1.442695, %v1277_v27  ;;  %v1280_v50 = vclamps-f32 %v1113_v43, 1e+10 }
 0x32b   :  { %v1287_v34 = vmul.f32 -1.442695, %v1279_v30  ;;  %v1286_v35 = vmul.f32 -1.442695, %v1278_v31 }
 0x32c   :  { %1425 = vpow2.f32 %v1285_v33  ;;  %v1288_v36 = vmul.f32 -1.442695, %v1280_v50 }
 0x32d   :  { %1427 = vpow2.f32 %v1287_v34 }
 0x32e   :  { %1429 = vpow2.f32 %v1286_v35 }
 0x32f   :  { %1431 = vpow2.f32 %v1288_v36 }
 0x336   :  { %v1426_v37 = vpop.eup %1425 }
 0x337   :  { %v1428_v38 = vpop.eup %1427  ;;  %v1161_v16 = vadd.f32 1.0, %v1426_v37 }
 0x338   :  { %v1430_v40 = vpop.eup %1429  ;;  %v1163_v41 = vadd.f32 1.0, %v1428_v38 }
 0x339   :  { %v1432_v39 = vpop.eup %1431  ;;  %1433 = vrcp.f32 %v1161_v16  ;;  %v1162_v42 = vadd.f32 1.0, %v1430_v40 }
 0x33a   :  { %1435 = vrcp.f32 %v1163_v41  ;;  %v1164_v44 = vadd.f32 1.0, %v1432_v39 }
 0x33b   :  { %1437 = vrcp.f32 %v1162_v42 }
 0x33c   :  { %1439 = vrcp.f32 %v1164_v44 }
 0x343   :  { %v1434_v45 = vpop.eup %1433 }
 0x344   :  { %v1436_v47 = vpop.eup %1435 }
 0x345   :  { %v1438_v48 = vpop.eup %1437 }
 0x346   :  { %v1440_v55 = vpop.eup %1439  ;;  %v1191_v52 = vcombine.low %v1434_v45, %v1438_v48 }
 0x347   :  { %v1192_v53 = vcombine.low %v1436_v47, %v1440_v55 }
 0x348   :  { %v1213_v54 = vrot.slane %v1191_v52, %v1198_v10 }
 0x349   :  { %v1220_v56 = vrot.slane %v1192_v53, %v1198_v10 }
 0x34b   :  { %v1222_v57 = vcombine.low %v1213_v54, %v1220_v56 }
 0x34d   :  { %v1236_v46 = vrot.slane %v1222_v57, %v1198_v10 }
 0x34f   :  { %v1237_v58 = vcombine.low %v1229_v13, %v1236_v46 }
 0x351   :  { %1239 = vst [vmem:[#allocation3] sm:$0xff] %v1237_v58 }
 0x352   :  { %1452 = shalt.err (!%p1449_p4)
}
 0x353   :  { %s1453_s25 = scalar_lea.hbm %s2108_s7, 128 }
 0x354   :  { %p1454_p5 = scmp.ne.s32.totalorder %s2108_s7, %s1453_s25  ;;  %p1457_p6 = scmp.lt.u32.totalorder %s1453_s25, %s2108_s7 }
 0x356   :  { %p1459_p7 = pnand %p1457_p6, %p1454_p5 }
 0x358   :  { %1462 = shalt.err (!%p1459_p7)
}
 0x359   :  { %1249 = dma.vmem_to_hbm [thread:$0]  %s1247_s21, 128, %s2108_s7, [#allocation4]  }
 0x35a   :  { %1463 = dma.done.wait [#allocation4], 128  }
 0x35b   :  { %1464 = vsyncadd [#allocation4], 4294967168 }
 0x35c   :  { %1253 = vsyncpa [#allocation4], 1 }

</bundles_post_ra>
